<compile_context>
chip_gen: v7x
topology: tpu7x:2x2x1
jax: 0.10.0
libtpu: 0.0.40
codegen_flags: <defaults>
</compile_context>

<pallas_src>
import functools

import jax
import jax.numpy as jnp
from jax.experimental import pallas as pl
from jax.experimental.pallas import tpu as pltpu

HIDDEN = 64
NUM_CLASSES = 10
HEAD_PAD = 128          # lane-dense fused-head width (>= 2 * NUM_CLASSES)
MAX_TB = 256            # batch tile cap (fills 2x256^2 MXU on v6e/v7x)


def _round_up(x, m):
    return ((x + m - 1) // m) * m


def _mlp_kernel(x_ref, w1_ref, b1_ref, w2_ref, b2_ref, wh_ref, bh_ref, o_ref):
    # hidden layer 1: (TB, Dp)bf16 @ (Dp, 64)bf16 -> f32, bias + ReLU in f32
    h1 = jnp.dot(x_ref[...], w1_ref[...], preferred_element_type=jnp.float32)
    h1 = jnp.maximum(h1 + b1_ref[...], 0.0)
    # hidden layer 2: (TB, 64)bf16 @ (64, 64)bf16 -> f32, bias + ReLU in f32
    h2 = jnp.dot(h1.astype(jnp.bfloat16), w2_ref[...],
                 preferred_element_type=jnp.float32)
    h2 = jnp.maximum(h2 + b2_ref[...], 0.0)
    # fused digit heads: (TB, 64)bf16 @ (64, 128)bf16 -> (TB, 128) f32
    o = jnp.dot(h2.astype(jnp.bfloat16), wh_ref[...],
                preferred_element_type=jnp.float32)
    o_ref[...] = (o + bh_ref[...]).astype(o_ref.dtype)


@functools.partial(jax.jit, static_argnames=())
def mlp_forward(x, params):
    """x: (B, C, H, W) float32 (NCHW). Returns (out_first_digit, out_second_digit)."""
    w1, b1, w2, b2, w3, b3, w4, b4 = params
    B = x.shape[0]
    xf = x.reshape(B, -1).astype(jnp.float32)   # Flatten(): all dims but batch
    D = xf.shape[1]

    # --- host/XLA-side layout prep (done once per call, all zero padding) ---
    Dp = _round_up(D, 128)                       # aligned K for first matmul
    Bp = _round_up(B, 8)                         # sublane alignment
    TB = min(MAX_TB, Bp)                         # batch tile (multiple of 8)
    Bp = _round_up(Bp, TB)

    xp = jnp.pad(xf, ((0, Bp - B), (0, Dp - D))).astype(jnp.bfloat16)
    w1p = jnp.pad(w1, ((0, Dp - D), (0, 0))).astype(jnp.bfloat16)
    w2b = w2.astype(jnp.bfloat16)
    # fuse the two heads and pad to a lane-dense 128-wide slab
    wh = jnp.pad(jnp.concatenate([w3, w4], axis=1),
                 ((0, 0), (0, HEAD_PAD - 2 * NUM_CLASSES))).astype(jnp.bfloat16)
    bh = jnp.pad(jnp.concatenate([b3, b4], axis=1),
                 ((0, 0), (0, HEAD_PAD - 2 * NUM_CLASSES))).astype(jnp.float32)

    const = lambda i: (0, 0)   # weights/biases: VMEM-resident across the grid

    out = pl.pallas_call(
        _mlp_kernel,
        out_shape=jax.ShapeDtypeStruct((Bp, HEAD_PAD), jnp.float32),
        grid=(Bp // TB,),
        in_specs=[
            pl.BlockSpec((TB, Dp), lambda i: (i, 0)),        # x tile
            pl.BlockSpec((Dp, HIDDEN), const),               # w1
            pl.BlockSpec((1, HIDDEN), const),                # b1
            pl.BlockSpec((HIDDEN, HIDDEN), const),           # w2
            pl.BlockSpec((1, HIDDEN), const),                # b2
            pl.BlockSpec((HIDDEN, HEAD_PAD), const),         # fused head w
            pl.BlockSpec((1, HEAD_PAD), const),              # fused head b
        ],
        out_specs=pl.BlockSpec((TB, HEAD_PAD), lambda i: (i, 0)),
        compiler_params=pltpu.CompilerParams(
            dimension_semantics=("parallel",)),
    )(xp, w1p, b1.astype(jnp.float32), w2b, b2.astype(jnp.float32), wh, bh)

    out_first_digit = out[:B, :NUM_CLASSES]
    out_second_digit = out[:B, NUM_CLASSES:2 * NUM_CLASSES]
    return out_first_digit, out_second_digit


def init_params(key, input_dimension):
    """Deterministic synthetic init (PyTorch-Linear-like uniform fan-in scaling)."""
    def linear(key, fan_in, fan_out):
        kw, kb = jax.random.split(key)
        bound = 1.0 / jnp.sqrt(fan_in)
        w = jax.random.uniform(kw, (fan_in, fan_out), jnp.float32, -bound, bound)
        b = jax.random.uniform(kb, (1, fan_out), jnp.float32, -bound, bound)
        return w, b

    k1, k2, k3, k4 = jax.random.split(key, 4)
    w1, b1 = linear(k1, input_dimension, HIDDEN)
    w2, b2 = linear(k2, HIDDEN, HIDDEN)
    w3, b3 = linear(k3, HIDDEN, NUM_CLASSES)
    w4, b4 = linear(k4, HIDDEN, NUM_CLASSES)
    return (w1, b1, w2, b2, w3, b3, w4, b4)


def reference_forward_bf16(x, params):
    """Pure-JAX reference mirroring the kernel's bf16-operand / f32-accum math."""
    w1, b1, w2, b2, w3, b3, w4, b4 = params
    xf = x.reshape(x.shape[0], -1)
    bf = jnp.bfloat16
    h1 = jnp.maximum(jnp.dot(xf.astype(bf), w1.astype(bf),
                             preferred_element_type=jnp.float32) + b1, 0.0)
    h2 = jnp.maximum(jnp.dot(h1.astype(bf), w2.astype(bf),
                             preferred_element_type=jnp.float32) + b2, 0.0)
    o1 = jnp.dot(h2.astype(bf), w3.astype(bf),
                 preferred_element_type=jnp.float32) + b3
    o2 = jnp.dot(h2.astype(bf), w4.astype(bf),
                 preferred_element_type=jnp.float32) + b4
    return o1, o2


if __name__ == "__main__":
    key = jax.random.PRNGKey(0)
    kx, kp = jax.random.split(key)

    # Small NCHW input: batch=8, 1 channel, 14x14 image -> input_dimension=196
    B, C, H, W = 8, 1, 14, 14
    x = jax.random.normal(kx, (B, C, H, W), jnp.float32)
    params = init_params(kp, C * H * W)

    out1, out2 = mlp_forward(x, params)
    out1, out2 = jax.block_until_ready((out1, out2))

    ref1, ref2 = reference_forward_bf16(x, params)
    assert out1.shape == (B, NUM_CLASSES) and out2.shape == (B, NUM_CLASSES)
    assert jnp.allclose(out1, ref1, atol=2e-3, rtol=2e-3)
    assert jnp.allclose(out2, ref2, atol=2e-3, rtol=2e-3)

    print("KERNEL_OK")
</pallas_src>

<mosaic_0001>
module attributes {stable_mosaic.version = 11 : i64} {
  func.func @_mlp_kernel(%arg0: i32, %arg1: memref<8x256xbf16, #tpu.memory_space<vmem>>, %arg2: memref<256x64xbf16, #tpu.memory_space<vmem>>, %arg3: memref<1x64xf32, #tpu.memory_space<vmem>>, %arg4: memref<64x64xbf16, #tpu.memory_space<vmem>>, %arg5: memref<1x64xf32, #tpu.memory_space<vmem>>, %arg6: memref<64x128xbf16, #tpu.memory_space<vmem>>, %arg7: memref<1x128xf32, #tpu.memory_space<vmem>>, %arg8: memref<8x128xf32, #tpu.memory_space<vmem>>) attributes {dimension_semantics = [#tpu.dimension_semantics<parallel>], iteration_bounds = array<i64: 1>, scalar_prefetch = 0 : i64, scratch_operands = 0 : i64, tpu.core_type = #tpu.core_type<tc>, window_params = [{transform_indices = @transform_0, window_bounds = array<i64: 8, 256>}, {pipeline_mode = #tpu.pipeline_mode<synchronous>, transform_indices = @transform_1, window_bounds = array<i64: 256, 64>}, {pipeline_mode = #tpu.pipeline_mode<synchronous>, transform_indices = @transform_2, window_bounds = array<i64: 1, 64>}, {pipeline_mode = #tpu.pipeline_mode<synchronous>, transform_indices = @transform_3, window_bounds = array<i64: 64, 64>}, {pipeline_mode = #tpu.pipeline_mode<synchronous>, transform_indices = @transform_4, window_bounds = array<i64: 1, 64>}, {pipeline_mode = #tpu.pipeline_mode<synchronous>, transform_indices = @transform_5, window_bounds = array<i64: 64, 128>}, {pipeline_mode = #tpu.pipeline_mode<synchronous>, transform_indices = @transform_6, window_bounds = array<i64: 1, 128>}, {transform_indices = @transform_7, window_bounds = array<i64: 8, 128>}]} {
    %c0 = arith.constant 0 : index
    %c0_0 = arith.constant 0 : index
    %0 = vector.load %arg1[%c0, %c0_0] : memref<8x256xbf16, #tpu.memory_space<vmem>>, vector<8x256xbf16>
    %c0_1 = arith.constant 0 : index
    %c0_2 = arith.constant 0 : index
    %1 = vector.load %arg2[%c0_1, %c0_2] : memref<256x64xbf16, #tpu.memory_space<vmem>>, vector<256x64xbf16>
    %cst = arith.constant dense<0.000000e+00> : vector<8x64xf32>
    %2 = tpu.matmul %0, %1, %cst {dimension_numbers = #tpu.dot_dimension_numbers<[1], [0], [0], [1], [0, 0, 1, 1], [], []>} : vector<8x256xbf16>, vector<256x64xbf16>, vector<8x64xf32> -> vector<8x64xf32>
    %c0_3 = arith.constant 0 : index
    %c0_4 = arith.constant 0 : index
    %3 = vector.load %arg3[%c0_3, %c0_4] : memref<1x64xf32, #tpu.memory_space<vmem>>, vector<1x64xf32>
    %4 = vector.broadcast %3 : vector<1x64xf32> to vector<8x64xf32>
    %5 = arith.addf %2, %4 : vector<8x64xf32>
    %cst_5 = arith.constant 0.000000e+00 : f32
    %6 = vector.broadcast %cst_5 : f32 to vector<8x64xf32>
    %7 = arith.maximumf %5, %6 : vector<8x64xf32>
    %8 = arith.truncf %7 : vector<8x64xf32> to vector<8x64xbf16>
    %c0_6 = arith.constant 0 : index
    %c0_7 = arith.constant 0 : index
    %9 = vector.load %arg4[%c0_6, %c0_7] : memref<64x64xbf16, #tpu.memory_space<vmem>>, vector<64x64xbf16>
    %cst_8 = arith.constant dense<0.000000e+00> : vector<8x64xf32>
    %10 = tpu.matmul %8, %9, %cst_8 {dimension_numbers = #tpu.dot_dimension_numbers<[1], [0], [0], [1], [0, 0, 1, 1], [], []>} : vector<8x64xbf16>, vector<64x64xbf16>, vector<8x64xf32> -> vector<8x64xf32>
    %c0_9 = arith.constant 0 : index
    %c0_10 = arith.constant 0 : index
    %11 = vector.load %arg5[%c0_9, %c0_10] : memref<1x64xf32, #tpu.memory_space<vmem>>, vector<1x64xf32>
    %12 = vector.broadcast %11 : vector<1x64xf32> to vector<8x64xf32>
    %13 = arith.addf %10, %12 : vector<8x64xf32>
    %cst_11 = arith.constant 0.000000e+00 : f32
    %14 = vector.broadcast %cst_11 : f32 to vector<8x64xf32>
    %15 = arith.maximumf %13, %14 : vector<8x64xf32>
    %16 = arith.truncf %15 : vector<8x64xf32> to vector<8x64xbf16>
    %c0_12 = arith.constant 0 : index
    %c0_13 = arith.constant 0 : index
    %17 = vector.load %arg6[%c0_12, %c0_13] : memref<64x128xbf16, #tpu.memory_space<vmem>>, vector<64x128xbf16>
    %cst_14 = arith.constant dense<0.000000e+00> : vector<8x128xf32>
    %18 = tpu.matmul %16, %17, %cst_14 {dimension_numbers = #tpu.dot_dimension_numbers<[1], [0], [0], [1], [0, 0, 1, 1], [], []>} : vector<8x64xbf16>, vector<64x128xbf16>, vector<8x128xf32> -> vector<8x128xf32>
    %c0_15 = arith.constant 0 : index
    %c0_16 = arith.constant 0 : index
    %19 = vector.load %arg7[%c0_15, %c0_16] : memref<1x128xf32, #tpu.memory_space<vmem>>, vector<1x128xf32>
    %20 = vector.broadcast %19 : vector<1x128xf32> to vector<8x128xf32>
    %21 = arith.addf %18, %20 : vector<8x128xf32>
    %c0_17 = arith.constant 0 : index
    %c0_18 = arith.constant 0 : index
    %22 = vector.load %arg8[%c0_17, %c0_18] : memref<8x128xf32, #tpu.memory_space<vmem>>, vector<8x128xf32>
    tpu.vector_store %arg8[%c0_17, %c0_18], %21 {strides = array<i32>} : memref<8x128xf32, #tpu.memory_space<vmem>>, vector<8x128xf32>,
    return
  }
  func.func @transform_0(%arg0: i32) -> (i32, i32) {
    %c0_i32 = arith.constant 0 : i32
    %c0_i32_0 = arith.constant 0 : i32
    return %arg0, %c0_i32 : i32, i32
  }
  func.func @transform_1(%arg0: i32) -> (i32, i32) {
    %c0_i32 = arith.constant 0 : i32
    %c0_i32_0 = arith.constant 0 : i32
    %c0_i32_1 = arith.constant 0 : i32
    return %c0_i32, %c0_i32_0 : i32, i32
  }
  func.func @transform_2(%arg0: i32) -> (i32, i32) {
    %c0_i32 = arith.constant 0 : i32
    %c0_i32_0 = arith.constant 0 : i32
    %c0_i32_1 = arith.constant 0 : i32
    return %c0_i32, %c0_i32_0 : i32, i32
  }
  func.func @transform_3(%arg0: i32) -> (i32, i32) {
    %c0_i32 = arith.constant 0 : i32
    %c0_i32_0 = arith.constant 0 : i32
    %c0_i32_1 = arith.constant 0 : i32
    return %c0_i32, %c0_i32_0 : i32, i32
  }
  func.func @transform_4(%arg0: i32) -> (i32, i32) {
    %c0_i32 = arith.constant 0 : i32
    %c0_i32_0 = arith.constant 0 : i32
    %c0_i32_1 = arith.constant 0 : i32
    return %c0_i32, %c0_i32_0 : i32, i32
  }
  func.func @transform_5(%arg0: i32) -> (i32, i32) {
    %c0_i32 = arith.constant 0 : i32
    %c0_i32_0 = arith.constant 0 : i32
    %c0_i32_1 = arith.constant 0 : i32
    return %c0_i32, %c0_i32_0 : i32, i32
  }
  func.func @transform_6(%arg0: i32) -> (i32, i32) {
    %c0_i32 = arith.constant 0 : i32
    %c0_i32_0 = arith.constant 0 : i32
    %c0_i32_1 = arith.constant 0 : i32
    return %c0_i32, %c0_i32_0 : i32, i32
  }
  func.func @transform_7(%arg0: i32) -> (i32, i32) {
    %c0_i32 = arith.constant 0 : i32
    %c0_i32_0 = arith.constant 0 : i32
    return %arg0, %c0_i32 : i32, i32
  }
}

</mosaic_0001>

<bundles_post_ra>
// kernel: mlp_forward.1
= control target key start
LH: loop header
LB: loop body
LE: loop exit
PB: predicated region body
PF: predicated region fallthrough
CT: control target
= control target key end

     0   :  { %v499_v1 = vmov 0.0   ;;  %vm500_vm0 = vmmov 0   ;;  %vm251_vm1 = vcmask 523264   ;;  %s642_s1 = inlined_call_operand.vmem [shape: bf16[256,64], index: 1, kind: input, shape index: {}]   ;;  %s643_s0 = inlined_call_operand.vmem [shape: bf16[8,256], index: 0, kind: input, shape index: {}]   ;;  %s644_s3 = inlined_call_operand.vmem [shape: bf16[64,64], index: 3, kind: input, shape index: {}]   ;;  %s645_s5 = inlined_call_operand.vmem [shape: bf16[64,128], index: 5, kind: input, shape index: {}]   ;;  %s646_s2 = inlined_call_operand.vmem [shape: f32[1,64], index: 2, kind: input, shape index: {}]   ;;  %s647_s4 = inlined_call_operand.vmem [shape: f32[1,64], index: 4, kind: input, shape index: {}]   ;;  %s648_s6 = inlined_call_operand.vmem [shape: f32[1,128], index: 6, kind: input, shape index: {}]   ;;  %s649_s7 = inlined_call_operand.vmem [shape: f32[8,128], index: 7, kind: output, shape index: {}]  }
   0x1   :  { %v473_v0 = vld [vmem:[%s642_s1 + $0x40] sm:$0xff]   ;;  %447 = vmatprep.subr.bf16.mxu1 %v499_v1  ;;  %v475_v3 = vld [vmem:[%s642_s1 + $0x48] sm:$0xff]   ;;  %v477_v5 = vld [vmem:[%s642_s1 + $0x50] sm:$0xff]   ;;  %455 = vmatprep.mubr.msk.bf16.mxu1 %vm500_vm0, %v499_v1 }
   0x2   :  { %v474_v2 = vld [vmem:[%s642_s1] sm:$0xff]   ;;  %415 = vmatprep.subr.bf16.mxu0 %v473_v0  ;;  %v476_v4 = vld [vmem:[%s642_s1 + $0x8] sm:$0xff]   ;;  %v478_v6 = vld [vmem:[%s642_s1 + $0x10] sm:$0xff]  }
   0x3   :  { %416 = vmatpush3.bf16.msra.mxu0 %v474_v2  ;;  %v479_v7 = vld [vmem:[%s642_s1 + $0x58] sm:$0xff]   ;;  %v481_v9 = vld [vmem:[%s642_s1 + $0x60] sm:$0xff]   ;;  %v483_v11 = vld [vmem:[%s642_s1 + $0x68] sm:$0xff]  }
   0x4   :  { %417 = vmatprep.subr.bf16.mxu0 %v475_v3  ;;  %v480_v8 = vld [vmem:[%s642_s1 + $0x18] sm:$0xff]   ;;  %v482_v10 = vld [vmem:[%s642_s1 + $0x20] sm:$0xff]   ;;  %v484_v15 = vld [vmem:[%s642_s1 + $0x28] sm:$0xff]  }
   0x5   :  { %v27_v12 = vld [vmem:[%s643_s0] sm:$0xff]  ;;  %v485_v16 = vld [vmem:[%s642_s1 + $0x70] sm:$0xff]   ;;  %v492_v17 = vld [vmem:[%s644_s3 + $0x8] sm:$0xff]  }
   0x6   :  { %v386_v13 = vcombine.high %v27_v12, %v27_v12  ;;  %v491_v14 = vld [vmem:[%s644_s3] sm:$0xff]   ;;  %v486_v18 = vld [vmem:[%s642_s1 + $0x30] sm:$0xff]   ;;  %v487_v19 = vld [vmem:[%s642_s1 + $0x78] sm:$0xff]   ;;  %v385_v21 = vcombine.low %v27_v12, %v27_v12 }
   0x7   :  { %418 = vmatpush3.bf16.msra.mxu0 %v476_v4  ;;  %448 = vmatpush3.bf16.msra.mxu1 %v491_v14  ;;  %v488_v20 = vld [vmem:[%s642_s1 + $0x38] sm:$0xff]   ;;  %v493_v22 = vld [vmem:[%s644_s3 + $0x10] sm:$0xff]   ;;  %v384_v25 = vld [vmem:[%s646_s2] ss:$0 sm:$0xff] }
   0x8   :  { %419 = vmatprep.subr.bf16.mxu0 %v477_v5  ;;  %202 = vmatprep.mubr.bf16.mxu0 %v386_v13  ;;  %v494_v23 = vld [vmem:[%s644_s3 + $0x18] sm:$0xff]   ;;  %v495_v32 = vld [vmem:[%s645_s5] sm:$0xff]   ;;  %v496_v34 = vld [vmem:[%s645_s5 + $0x8] sm:$0xff]  }
   0x9   :  { %449 = vmatprep.subr.bf16.mxu1 %v499_v1  ;;  %v497_v35 = vld [vmem:[%s645_s5 + $0x10] sm:$0xff]   ;;  %v498_v36 = vld [vmem:[%s645_s5 + $0x18] sm:$0xff]   ;;  %v403_v37 = vld [vmem:[%s647_s4] ss:$0 sm:$0xff] }
   0xa   :  { %v409_v45 = vld [vmem:[%s648_s6] ss:$0 sm:$0xff] }
   0xb   :  { %420 = vmatpush3.bf16.msra.mxu0 %v478_v6  ;;  %450 = vmatpush3.bf16.msra.mxu1 %v492_v17 }
   0xc   :  { %421 = vmatprep.subr.bf16.mxu0 %v479_v7  ;;  %451 = vmatprep.subr.bf16.mxu1 %v499_v1 }
   0xf   :  { %422 = vmatpush3.bf16.msra.mxu0 %v480_v8  ;;  %452 = vmatpush3.bf16.msra.mxu1 %v493_v22 }
  0x10   :  { %423 = vmatprep.subr.bf16.mxu0 %v481_v9  ;;  %453 = vmatprep.subr.bf16.mxu1 %v499_v1 }
  0x13   :  { %424 = vmatpush3.bf16.msra.mxu0 %v482_v10  ;;  %454 = vmatpush3.bf16.msra.mxu1 %v494_v23 }
  0x14   :  { %425 = vmatprep.subr.bf16.mxu0 %v483_v11  ;;  %459 = vmatprep.subr.bf16.mxu1 %v499_v1 }
  0x17   :  { %426 = vmatpush3.bf16.msra.mxu0 %v484_v15 }
  0x18   :  { %427 = vmatprep.subr.bf16.mxu0 %v485_v16 }
  0x1b   :  { %428 = vmatpush3.bf16.msra.mxu0 %v486_v18 }
  0x1c   :  { %429 = vmatprep.subr.bf16.mxu0 %v487_v19 }
  0x1f   :  { %430 = vmatpush3.bf16.msra.mxu0 %v488_v20 }
  0x22   :  { %203 = vmatmul.mubr.bf16.vlgmr.msra.gmra.mrb[0].mxu0 %v385_v21 }
  0xf5   :  { %v431_v24 = vpop.f32.mrb[0].mxu0 }
  0xf6   :  { %v432_v26 = vpop.f32.mrb[1].mxu0 }
  0xf7   :  { %v433_v27 = vadd.f32 %v432_v26, %v431_v24  ;;  %v434_v28 = vpop.f32.mrb[2].mxu0 }
  0xf8   :  { %v435_v29 = vpop.f32.mrb[3].mxu0 }
  0xf9   :  { %v205_v30 = vadd.f32 %v433_v27, %v384_v25 }
  0xfb   :  { %v210_v31 = vmax.f32 %v205_v30, 0.0 }
  0xfd   :  { %v211_v33 = vpack.c.bf16 %v210_v31, %v210_v31 }
  0xff   :  { %456 = vmatmul.mubr.msk.bf16.vlgmr.msra.gmra.mrb[0].mxu1 %vm251_vm1, %v211_v33 }
 0x100   :  { %460 = vmatpush3.bf16.msra.mxu1 %v495_v32  ;;  %467 = vmatprep.mubr.msk.bf16.mxu1 %vm500_vm0, %v499_v1 }
 0x101   :  { %461 = vmatprep.subr.bf16.mxu1 %v499_v1 }
 0x104   :  { %462 = vmatpush3.bf16.msra.mxu1 %v496_v34 }
 0x105   :  { %463 = vmatprep.subr.bf16.mxu1 %v499_v1 }
 0x108   :  { %464 = vmatpush3.bf16.msra.mxu1 %v497_v35 }
 0x109   :  { %465 = vmatprep.subr.bf16.mxu1 %v499_v1 }
 0x10c   :  { %466 = vmatpush3.bf16.msra.mxu1 %v498_v36 }
 0x1d2   :  { %v289_v38 = vpop.f32.mrb[0].mxu1 }
 0x1d3   :  { %v290_v39 = vadd.f32 %v403_v37, %v289_v38  ;;  %v457_v40 = vpop.f32.mrb[1].mxu1 }
 0x1d4   :  { %v292_v41 = vpop.f32.mrb[2].mxu1 }
 0x1d5   :  { %v295_v42 = vmax.f32 %v290_v39, 0.0  ;;  %v458_v43 = vpop.f32.mrb[3].mxu1 }
 0x1d7   :  { %v296_v44 = vpack.c.bf16 %v295_v42, %v295_v42 }
 0x1d9   :  { %468 = vmatmul.mubr.msk.bf16.vlgmr.msra.gmra.mrb[4].mxu1 %vm251_vm1, %v296_v44 }
 0x2ac   :  { %v373_v46 = vpop.f32.mrb[4].mxu1 }
 0x2ad   :  { %v374_v47 = vadd.f32 %v409_v45, %v373_v46  ;;  %v469_v48 = vpop.f32.mrb[5].mxu1 }
 0x2ae   :  { %v376_v49 = vpop.f32.mrb[6].mxu1 }
 0x2af   :  { %379 = vst [vmem:[%s649_s7] sm:$0xff] %v374_v47  ;;  %v470_v50 = vpop.f32.mrb[7].mxu1 }

</bundles_post_ra>
